<compile_context>
chip_gen: v7x
topology: tpu7x:2x2x1
jax: 0.10.0
libtpu: 0.0.40
codegen_flags: <defaults>
</compile_context>

<pallas_src>
import jax
import jax.numpy as jnp
from jax import lax
from jax.experimental import pallas as pl
from jax.experimental.pallas import tpu as pltpu


def _round_up(a, b):
    return (a + b - 1) // b * b


def ffn_kernel(x_ref, w1_ref, b1_ref, w2_ref, b2_ref, o_ref):
    """One (tm, E) row tile x one th-wide hidden block of the fused FFN.

    x_ref:  (tm, E)  f32 (cast to bf16 in-kernel for the MXU)
    w1_ref: (E, th)  bf16  (streamed over the hidden/reduction grid axis)
    b1_ref: (1, th)  f32
    w2_ref: (th, E)  bf16  (streamed over the hidden/reduction grid axis)
    b2_ref: (1, E)   f32
    o_ref:  (tm, E)  f32 — VMEM-resident across the hidden axis, used as the
                            accumulator (zeroed at h==0, bias added at h==last)
    """
    h_idx = pl.program_id(1)

    @pl.when(h_idx == 0)
    def _():
        o_ref[...] = jnp.zeros_like(o_ref)

    # First matmul: bf16 operands on the MXU, f32 accumulation.
    x_bf = x_ref[...].astype(jnp.bfloat16)
    h = jnp.dot(x_bf, w1_ref[...], preferred_element_type=jnp.float32)
    h = h + b1_ref[...]

    # Exact (erf-based) GELU in f32 — matches torch.nn.GELU(approximate='none').
    g = 0.5 * h * (1.0 + lax.erf(h * 0.7071067811865476))

    # Second matmul: accumulate this hidden block's partial product directly
    # into the resident f32 output block.
    o_ref[...] += jnp.dot(g.astype(jnp.bfloat16), w2_ref[...],
                          preferred_element_type=jnp.float32)

    @pl.when(h_idx == pl.num_programs(1) - 1)
    def _():
        o_ref[...] += b2_ref[...]


def feed_forward(x, w1, b1, w2, b2, *, tm=512, th=None):
    """x: (B, S, E) float32 -> (B, S, E) float32.

    w1: (E, H), b1: (H,), w2: (H, E), b2: (E,) with H = 4*E.
    For best performance pass w1/w2 already cast to bfloat16 (cached).
    """
    B, S, E = x.shape
    H = w1.shape[1]
    M = B * S

    # --- chip-aware VMEM budget -------------------------------------------
    try:
        vmem_cap = int(getattr(pltpu.get_tpu_info(), "vmem_capacity_bytes",
                               64 * 1024 * 1024))
    except Exception:
        vmem_cap = 64 * 1024 * 1024          # conservative (v7x-sized) fallback
    vmem_budget = int(0.70 * vmem_cap)       # headroom for compiler temporaries

    # --- row tile ------------------------------------------------------------
    tm = max(16, _round_up(tm, 16))
    M16 = _round_up(M, 16)
    if M16 <= tm:
        # Small M: prefer two row tiles so both v7x TensorCores get work.
        tm = _round_up((M + 1) // 2, 16) if M > 16 else M16

    def vmem_bytes(tm_, th_):
        return (
            2 * tm_ * E * 4        # x tile (f32), double-buffered
            + 2 * E * th_ * 2      # W1 block (bf16), double-buffered
            + 2 * th_ * E * 2      # W2 block (bf16), double-buffered
            + 2 * (th_ + E) * 4    # b1/b2 blocks (f32), double-buffered
            + 2 * tm_ * E * 4      # output tile (f32, accumulated in place)
            + 2 * tm_ * th_ * 4    # (tm, th) f32 hidden/GELU temporaries
        )

    # --- hidden tile: resident-weights fast path when the budget allows ------
    if th is None:
        th = H
        if vmem_bytes(tm, th) > vmem_budget:
            for t in (1024, 512, 256, 128):
                if t < H and H % t == 0:
                    th = t
                    if vmem_bytes(tm, th) <= vmem_budget:
                        break
    assert H % th == 0 and (th % 128 == 0 or th == H), (
        f"hidden dim H={H} needs a 128-multiple tile, got th={th}")

    # Last resort for very large shapes: shrink the row tile.
    while vmem_bytes(tm, th) > vmem_budget and tm > 16:
        tm = max(16, _round_up(tm // 2, 16))

    Mp = _round_up(M, tm)

    # --- operands -------------------------------------------------------------
    x2 = x.reshape(M, E)                      # f32, cast happens inside the kernel
    if Mp != M:
        x2 = jnp.pad(x2, ((0, Mp - M), (0, 0)))
    w1_bf = w1 if w1.dtype == jnp.bfloat16 else w1.astype(jnp.bfloat16)
    w2_bf = w2 if w2.dtype == jnp.bfloat16 else w2.astype(jnp.bfloat16)
    b1_2 = b1.reshape(1, H).astype(jnp.float32)
    b2_2 = b2.reshape(1, E).astype(jnp.float32)

    vmem_limit = min(vmem_cap,
                     max(32 * 1024 * 1024, int(1.5 * vmem_bytes(tm, th))))

    out = pl.pallas_call(
        ffn_kernel,
        out_shape=jax.ShapeDtypeStruct((Mp, E), jnp.float32),
        grid_spec=pltpu.PrefetchScalarGridSpec(
            num_scalar_prefetch=0,
            grid=(Mp // tm, H // th),                          # (row tiles, hidden blocks)
            in_specs=[
                pl.BlockSpec((tm, E), lambda i, h: (i, 0)),    # x rows (resident over h)
                pl.BlockSpec((E, th), lambda i, h: (0, h)),    # W1 hidden slab
                pl.BlockSpec((1, th), lambda i, h: (0, h)),    # b1 hidden slab
                pl.BlockSpec((th, E), lambda i, h: (h, 0)),    # W2 hidden slab
                pl.BlockSpec((1, E), lambda i, h: (0, 0)),     # b2 (resident)
            ],
            out_specs=pl.BlockSpec((tm, E), lambda i, h: (i, 0)),  # resident accumulator
        ),
        compiler_params=pltpu.CompilerParams(
            dimension_semantics=("parallel", "arbitrary"),
            vmem_limit_bytes=vmem_limit,
        ),
    )(x2, w1_bf, b1_2, w2_bf, b2_2)

    return out[:M].reshape(B, S, E)


def _ref_ffn_bf16(x, w1, b1, w2, b2):
    """Reference with the same bf16-operand / f32-accumulate numerics as the kernel."""
    h = jnp.dot(x.astype(jnp.bfloat16), w1.astype(jnp.bfloat16),
                preferred_element_type=jnp.float32) + b1
    g = 0.5 * h * (1.0 + lax.erf(h * 0.7071067811865476))
    return jnp.dot(g.astype(jnp.bfloat16), w2.astype(jnp.bfloat16),
                   preferred_element_type=jnp.float32) + b2


if __name__ == "__main__":
    B, S, E = 2, 8, 128       # E multiple of 128 -> lane-dense output stores
    H = 4 * E                 # 512 -> fully VMEM-resident weights on this shape

    key = jax.random.PRNGKey(0)
    kx, k1, kb1, k2, kb2 = jax.random.split(key, 5)

    x = jax.random.normal(kx, (B, S, E), dtype=jnp.float32)
    # Deterministic parameter init (shapes match nn.Linear(E, 4E) and nn.Linear(4E, E))
    w1 = jax.random.normal(k1, (E, H), dtype=jnp.float32) * (1.0 / jnp.sqrt(E))
    b1 = jax.random.normal(kb1, (H,), dtype=jnp.float32) * 0.01
    w2 = jax.random.normal(k2, (H, E), dtype=jnp.float32) * (1.0 / jnp.sqrt(H))
    b2 = jax.random.normal(kb2, (E,), dtype=jnp.float32) * 0.01

    # Pre-cast weights to bf16 once (caller-side cache) so no per-call HBM
    # weight-cast sweep happens inside the wrapper.
    w1_bf = w1.astype(jnp.bfloat16)
    w2_bf = w2.astype(jnp.bfloat16)

    out = feed_forward(x, w1_bf, b1, w2_bf, b2)
    out = jax.block_until_ready(out)

    ref = _ref_ffn_bf16(x.reshape(-1, E), w1, b1, w2, b2).reshape(B, S, E)
    assert out.shape == (B, S, E)
    max_err = float(jnp.max(jnp.abs(out - ref)))
    assert jnp.allclose(out, ref, atol=2e-3, rtol=2e-3), f"mismatch vs reference (max err {max_err})"
    print("KERNEL_OK")
</pallas_src>

<mosaic_0001>
module attributes {stable_mosaic.version = 11 : i64} {
  func.func @ffn_kernel(%arg0: i32, %arg1: i32, %arg2: memref<16x128xf32, #tpu.memory_space<vmem>>, %arg3: memref<128x512xbf16, #tpu.memory_space<vmem>>, %arg4: memref<1x512xf32, #tpu.memory_space<vmem>>, %arg5: memref<512x128xbf16, #tpu.memory_space<vmem>>, %arg6: memref<1x128xf32, #tpu.memory_space<vmem>>, %arg7: memref<16x128xf32, #tpu.memory_space<vmem>>) attributes {dimension_semantics = [#tpu.dimension_semantics<parallel>, #tpu.dimension_semantics<arbitrary>], iteration_bounds = array<i64: 1, 1>, scalar_prefetch = 0 : i64, scratch_operands = 0 : i64, tpu.core_type = #tpu.core_type<tc>, window_params = [{transform_indices = @transform_0, window_bounds = array<i64: 16, 128>}, {transform_indices = @transform_1, window_bounds = array<i64: 128, 512>}, {transform_indices = @transform_2, window_bounds = array<i64: 1, 512>}, {transform_indices = @transform_3, window_bounds = array<i64: 512, 128>}, {pipeline_mode = #tpu.pipeline_mode<synchronous>, transform_indices = @transform_4, window_bounds = array<i64: 1, 128>}, {transform_indices = @transform_5, window_bounds = array<i64: 16, 128>}]} {
    %c0_i32 = arith.constant 0 : i32
    %0 = arith.cmpi eq, %arg1, %c0_i32 : i32
    %1 = arith.extui %0 : i1 to i32
    %c0_i32_0 = arith.constant 0 : i32
    %2 = arith.cmpi ne, %1, %c0_i32_0 : i32
    scf.if %2 {
      %cst_18 = arith.constant 0.000000e+00 : f32
      %27 = vector.broadcast %cst_18 : f32 to vector<16x128xf32>
      %c0_19 = arith.constant 0 : index
      %c0_20 = arith.constant 0 : index
      %28 = vector.load %arg7[%c0_19, %c0_20] : memref<16x128xf32, #tpu.memory_space<vmem>>, vector<16x128xf32>
      tpu.vector_store %arg7[%c0_19, %c0_20], %27 {strides = array<i32>} : memref<16x128xf32, #tpu.memory_space<vmem>>, vector<16x128xf32>,
    } else {
    }
    %c0 = arith.constant 0 : index
    %c0_1 = arith.constant 0 : index
    %3 = vector.load %arg2[%c0, %c0_1] : memref<16x128xf32, #tpu.memory_space<vmem>>, vector<16x128xf32>
    %4 = arith.truncf %3 : vector<16x128xf32> to vector<16x128xbf16>
    %c0_2 = arith.constant 0 : index
    %c0_3 = arith.constant 0 : index
    %5 = vector.load %arg3[%c0_2, %c0_3] : memref<128x512xbf16, #tpu.memory_space<vmem>>, vector<128x512xbf16>
    %cst = arith.constant dense<0.000000e+00> : vector<16x512xf32>
    %6 = tpu.matmul %4, %5, %cst {dimension_numbers = #tpu.dot_dimension_numbers<[1], [0], [0], [1], [0, 0, 1, 1], [], []>} : vector<16x128xbf16>, vector<128x512xbf16>, vector<16x512xf32> -> vector<16x512xf32>
    %c0_4 = arith.constant 0 : index
    %c0_5 = arith.constant 0 : index
    %7 = vector.load %arg4[%c0_4, %c0_5] : memref<1x512xf32, #tpu.memory_space<vmem>>, vector<1x512xf32>
    %8 = vector.broadcast %7 : vector<1x512xf32> to vector<16x512xf32>
    %9 = arith.addf %6, %8 : vector<16x512xf32>
    %cst_6 = arith.constant 5.000000e-01 : f32
    %10 = vector.broadcast %cst_6 : f32 to vector<16x512xf32>
    %11 = arith.mulf %10, %9 : vector<16x512xf32>
    %cst_7 = arith.constant 0.707106769 : f32
    %12 = vector.broadcast %cst_7 : f32 to vector<16x512xf32>
    %13 = arith.mulf %9, %12 : vector<16x512xf32>
    %14 = math.erf %13 : vector<16x512xf32>
    %cst_8 = arith.constant 1.000000e+00 : f32
    %15 = vector.broadcast %cst_8 : f32 to vector<16x512xf32>
    %16 = arith.addf %15, %14 : vector<16x512xf32>
    %17 = arith.mulf %11, %16 : vector<16x512xf32>
    %c0_9 = arith.constant 0 : index
    %c0_10 = arith.constant 0 : index
    %18 = vector.load %arg7[%c0_9, %c0_10] : memref<16x128xf32, #tpu.memory_space<vmem>>, vector<16x128xf32>
    %19 = arith.truncf %17 : vector<16x512xf32> to vector<16x512xbf16>
    %c0_11 = arith.constant 0 : index
    %c0_12 = arith.constant 0 : index
    %20 = vector.load %arg5[%c0_11, %c0_12] : memref<512x128xbf16, #tpu.memory_space<vmem>>, vector<512x128xbf16>
    %cst_13 = arith.constant dense<0.000000e+00> : vector<16x128xf32>
    %21 = tpu.matmul %19, %20, %cst_13 {dimension_numbers = #tpu.dot_dimension_numbers<[1], [0], [0], [1], [0, 0, 1, 1], [], []>} : vector<16x512xbf16>, vector<512x128xbf16>, vector<16x128xf32> -> vector<16x128xf32>
    %22 = arith.addf %18, %21 : vector<16x128xf32>
    %c0_14 = arith.constant 0 : index
    %c0_15 = arith.constant 0 : index
    %23 = vector.load %arg7[%c0_14, %c0_15] : memref<16x128xf32, #tpu.memory_space<vmem>>, vector<16x128xf32>
    tpu.vector_store %arg7[%c0_14, %c0_15], %22 {strides = array<i32>} : memref<16x128xf32, #tpu.memory_space<vmem>>, vector<16x128xf32>,
    %c0_i32_16 = arith.constant 0 : i32
    %24 = arith.cmpi eq, %arg1, %c0_i32_16 : i32
    %25 = arith.extui %24 : i1 to i32
    %c0_i32_17 = arith.constant 0 : i32
    %26 = arith.cmpi ne, %25, %c0_i32_17 : i32
    scf.if %26 {
      %c0_18 = arith.constant 0 : index
      %c0_19 = arith.constant 0 : index
      %27 = vector.load %arg7[%c0_18, %c0_19] : memref<16x128xf32, #tpu.memory_space<vmem>>, vector<16x128xf32>
      %c0_20 = arith.constant 0 : index
      %c0_21 = arith.constant 0 : index
      %28 = vector.load %arg6[%c0_20, %c0_21] : memref<1x128xf32, #tpu.memory_space<vmem>>, vector<1x128xf32>
      %29 = vector.broadcast %28 : vector<1x128xf32> to vector<16x128xf32>
      %30 = arith.addf %27, %29 : vector<16x128xf32>
      %c0_22 = arith.constant 0 : index
      %c0_23 = arith.constant 0 : index
      %31 = vector.load %arg7[%c0_22, %c0_23] : memref<16x128xf32, #tpu.memory_space<vmem>>, vector<16x128xf32>
      tpu.vector_store %arg7[%c0_22, %c0_23], %30 {strides = array<i32>} : memref<16x128xf32, #tpu.memory_space<vmem>>, vector<16x128xf32>,
    } else {
    }
    return
  }
  func.func @transform_0(%arg0: i32, %arg1: i32) -> (i32, i32) {
    %c0_i32 = arith.constant 0 : i32
    %c0_i32_0 = arith.constant 0 : i32
    return %arg0, %c0_i32 : i32, i32
  }
  func.func @transform_1(%arg0: i32, %arg1: i32) -> (i32, i32) {
    %c0_i32 = arith.constant 0 : i32
    %c0_i32_0 = arith.constant 0 : i32
    return %c0_i32, %arg1 : i32, i32
  }
  func.func @transform_2(%arg0: i32, %arg1: i32) -> (i32, i32) {
    %c0_i32 = arith.constant 0 : i32
    %c0_i32_0 = arith.constant 0 : i32
    return %c0_i32, %arg1 : i32, i32
  }
  func.func @transform_3(%arg0: i32, %arg1: i32) -> (i32, i32) {
    %c0_i32 = arith.constant 0 : i32
    %c0_i32_0 = arith.constant 0 : i32
    return %arg1, %c0_i32 : i32, i32
  }
  func.func @transform_4(%arg0: i32, %arg1: i32) -> (i32, i32) {
    %c0_i32 = arith.constant 0 : i32
    %c0_i32_0 = arith.constant 0 : i32
    %c0_i32_1 = arith.constant 0 : i32
    return %c0_i32, %c0_i32_0 : i32, i32
  }
  func.func @transform_5(%arg0: i32, %arg1: i32) -> (i32, i32) {
    %c0_i32 = arith.constant 0 : i32
    %c0_i32_0 = arith.constant 0 : i32
    return %arg0, %c0_i32 : i32, i32
  }
}

</mosaic_0001>

<bundles_post_ra>
// kernel: tpu_custom_call.1
= control target key start
LH: loop header
LB: loop body
LE: loop exit
PB: predicated region body
PF: predicated region fallthrough
CT: control target
= control target key end

     0   :  { %10 = vsyncpa [#allocation3], 0  ;;  %s1206_s0 = inlined_call_operand.hbm [shape: f32[16,128], index: 0, kind: input, shape index: {}]   ;;  %s1207_s1 = inlined_call_operand.hbm [shape: bf16[128,512], index: 1, kind: input, shape index: {}]   ;;  %s1208_s2 = inlined_call_operand.vmem [shape: f32[1,512], index: 2, kind: input, shape index: {}]   ;;  %s1209_s3 = inlined_call_operand.hbm [shape: bf16[512,128], index: 3, kind: input, shape index: {}]   ;;  %s1210_s4 = inlined_call_operand.vmem [shape: f32[1,128], index: 4, kind: input, shape index: {}]   ;;  %s1211_s5 = inlined_call_operand.hbm [shape: f32[16,128], index: 5, kind: output, shape index: {}]  }
   0x1   :  { %11 = vsyncpa [#allocation6], 0 }
   0x2   :  { %12 = vsyncpa [#allocation4], 0  ;;  %s1105_s18 = smov [#allocation5]   ;;  %s1011_s22 = scalar_lea.hbm %s1207_s1, 4096 }
   0x3   :  { %s30_s19 = sshll.u32 %s1105_s18, 4  ;;  %p1012_p0 = scmp.ne.s32.totalorder %s1207_s1, %s1011_s22  ;;  %s31_s19 = int_to_ptr.vmem [resolvable:$true] %s30_s19 }
   0x4   :  { %p1015_p1 = scmp.lt.u32.totalorder %s1011_s22, %s1207_s1 }
   0x6   :  { %p1017_p2 = pnand %p1015_p1, %p1012_p0 }
   0x8   :  { %1020 = shalt.err (!%p1017_p2)
}
   0x9   :  { %s1021_s27 = scalar_lea.vmem %s31_s19, 4096  ;;  %p1026_p4 = scmp.lt.s32.totalorder %s31_s19, %s31_s19 }
   0xa   :  { %p1022_p3 = scmp.ne.s32.totalorder %s31_s19, %s1021_s27  ;;  %p1027_p5 = scmp.lt.s32.totalorder %s1021_s27, %s1021_s27 }
   0xc   :  { %p1028_p6 = por %p1027_p5, %p1026_p4 }
   0xe   :  { %p1029_p7 = pnand %p1028_p6, %p1022_p3 }
  0x10   :  { %1032 = shalt.err (!%p1029_p7)
}
  0x11   :  { %s1106_s28 = smov 256   ;;  %s1107_s29 = smov 16  }
  0x12   :  { %36 = dma.hbm_to_vmem [thread:$0]  %s1207_s1, 4096, %s31_s19, [#allocation6], %s1106_s28, %s1106_s28, %s1107_s29  }
  0x13   :  { %s1108_s7 = smov [#allocation2]   ;;  %s1033_s11 = scalar_lea.hbm %s1206_s0, 256 }
  0x14   :  { %s18_s8 = sshll.u32 %s1108_s7, 4  ;;  %p1034_p8 = scmp.ne.s32.totalorder %s1206_s0, %s1033_s11  ;;  %s19_s8 = int_to_ptr.vmem [resolvable:$true] %s18_s8 }
  0x15   :  { %p1037_p9 = scmp.lt.u32.totalorder %s1033_s11, %s1206_s0 }
  0x17   :  { %p1039_p10 = pnand %p1037_p9, %p1034_p8 }
  0x19   :  { %1042 = shalt.err (!%p1039_p10)
}
  0x1a   :  { %s1043_s16 = scalar_lea.vmem %s19_s8, 256  ;;  %p1048_p12 = scmp.lt.s32.totalorder %s19_s8, %s19_s8 }
  0x1b   :  { %p1044_p11 = scmp.ne.s32.totalorder %s19_s8, %s1043_s16  ;;  %p1049_p13 = scmp.lt.s32.totalorder %s1043_s16, %s1043_s16 }
  0x1d   :  { %p1050_p0 = por %p1049_p13, %p1048_p12 }
  0x1f   :  { %p1051_p1 = pnand %p1050_p0, %p1044_p11 }
  0x21   :  { %1054 = shalt.err (!%p1051_p1)
}
  0x22   :  { %s1109_s1 = smov 128   ;;  %s1110_s17 = smov 8  }
  0x23   :  { %24 = dma.hbm_to_vmem [thread:$0]  %s1206_s0, 256, %s19_s8, [#allocation3], %s1109_s1, %s1109_s1, %s1110_s17  }
  0x24   :  { %s1111_s20 = smov [#allocation7]   ;;  %s1055_s24 = scalar_lea.hbm %s1209_s3, 4096 }
  0x25   :  { %s44_s21 = sshll.u32 %s1111_s20, 4  ;;  %p1056_p2 = scmp.ne.s32.totalorder %s1209_s3, %s1055_s24  ;;  %s45_s21 = int_to_ptr.vmem [resolvable:$true] %s44_s21 }
  0x26   :  { %p1059_p3 = scmp.lt.u32.totalorder %s1055_s24, %s1209_s3 }
  0x28   :  { %p1061_p4 = pnand %p1059_p3, %p1056_p2 }
  0x2a   :  { %1064 = shalt.err (!%p1061_p4)
}
  0x2b   :  { %s1065_s29 = scalar_lea.vmem %s45_s21, 4096  ;;  %p1070_p6 = scmp.lt.s32.totalorder %s45_s21, %s45_s21 }
  0x2c   :  { %p1066_p5 = scmp.ne.s32.totalorder %s45_s21, %s1065_s29  ;;  %p1071_p7 = scmp.lt.s32.totalorder %s1065_s29, %s1065_s29 }
  0x2e   :  { %p1072_p8 = por %p1071_p7, %p1070_p6 }
  0x30   :  { %p1073_p9 = pnand %p1072_p8, %p1066_p5 }
  0x32   :  { %1076 = shalt.err (!%p1073_p9)
}
  0x33   :  { %s1112_s0 = smov 64   ;;  %s1113_s30 = smov 4  }
  0x34   :  { %50 = dma.hbm_to_vmem [thread:$0]  %s1209_s3, 4096, %s45_s21, [#allocation6], %s1112_s0, %s1112_s0, %s1113_s30  }
  0x35   :  { %1099 = dma.done.wait [#allocation3], 256  }
  0x36   :  { %1100 = vsyncadd [#allocation3], 4294967040 }
  0x37   :  { %1101 = dma.done.wait [#allocation6], 8192  }
  0x38   :  { %1102 = vsyncadd [#allocation6], 4294959104  ;;  %v1114_v0 = vmov 0   ;;  %v915_v1 = vld [vmem:[#allocation5 + $0x4] ss:$16 sps:$4 sm:$0xff]   ;;  %v70_v34 = vld [vmem:[#allocation2 + $0x8] sm:$0xff] }
  0x39   :  { %318 = vmatprep.mubr.bf16.mxu0 %v1114_v0  ;;  %361 = vmatprep.mubr.bf16.mxu1 %v1114_v0  ;;  %v917_v2 = vld [vmem:[#allocation5 + $0xc] ss:$16 sps:$4 sm:$0xff]   ;;  %v919_v3 = vld [vmem:[#allocation5] ss:$16 sps:$4 sm:$0xff]   ;;  %v920_v4 = vld [vmem:[#allocation5 + $0x8] ss:$16 sps:$4 sm:$0xff]  }
  0x3a   :  { %286 = vmatprep.subr.bf16.mxu0 %v915_v1  ;;  %329 = vmatprep.subr.bf16.mxu1 %v917_v2  ;;  %v921_v5 = vld [vmem:[#allocation5 + $0x24] ss:$16 sps:$4 sm:$0xff]   ;;  %v923_v6 = vld [vmem:[#allocation5 + $0x2c] ss:$16 sps:$4 sm:$0xff]   ;;  %v925_v7 = vld [vmem:[#allocation5 + $0x20] ss:$16 sps:$4 sm:$0xff]  }
  0x3b   :  { %287 = vmatpush1.bf16.msra.mxu0 %v919_v3  ;;  %330 = vmatpush1.bf16.msra.mxu1 %v920_v4  ;;  %v926_v8 = vld [vmem:[#allocation5 + $0x28] ss:$16 sps:$4 sm:$0xff]   ;;  %v927_v9 = vld [vmem:[#allocation5 + $0x44] ss:$16 sps:$4 sm:$0xff]   ;;  %v929_v10 = vld [vmem:[#allocation5 + $0x4c] ss:$16 sps:$4 sm:$0xff]   ;;  %v106_v4 = vlaneseq }
  0x3c   :  { %288 = vmatprep.subr.bf16.mxu0 %v921_v5  ;;  %331 = vmatprep.subr.bf16.mxu1 %v923_v6  ;;  %v931_v11 = vld [vmem:[#allocation5 + $0x40] ss:$16 sps:$4 sm:$0xff]   ;;  %v932_v12 = vld [vmem:[#allocation5 + $0x48] ss:$16 sps:$4 sm:$0xff]   ;;  %v933_v13 = vld [vmem:[#allocation5 + $0x64] ss:$16 sps:$4 sm:$0xff]  }
  0x3d   :  { %v935_v14 = vld [vmem:[#allocation5 + $0x6c] ss:$16 sps:$4 sm:$0xff]   ;;  %v937_v15 = vld [vmem:[#allocation5 + $0x60] ss:$16 sps:$4 sm:$0xff]   ;;  %v938_v16 = vld [vmem:[#allocation5 + $0x68] ss:$16 sps:$4 sm:$0xff]  }
  0x3e   :  { %v939_v17 = vld [vmem:[#allocation5 + $0x84] ss:$16 sps:$4 sm:$0xff]   ;;  %v941_v18 = vld [vmem:[#allocation5 + $0x8c] ss:$16 sps:$4 sm:$0xff]   ;;  %v943_v19 = vld [vmem:[#allocation5 + $0x80] ss:$16 sps:$4 sm:$0xff]  }
  0x3f   :  { %289 = vmatpush1.bf16.msra.mxu0 %v925_v7  ;;  %332 = vmatpush1.bf16.msra.mxu1 %v926_v8  ;;  %v944_v20 = vld [vmem:[#allocation5 + $0x88] ss:$16 sps:$4 sm:$0xff]   ;;  %v945_v21 = vld [vmem:[#allocation5 + $0xa4] ss:$16 sps:$4 sm:$0xff]   ;;  %v947_v22 = vld [vmem:[#allocation5 + $0xac] ss:$16 sps:$4 sm:$0xff]  }
  0x40   :  { %290 = vmatprep.subr.bf16.mxu0 %v927_v9  ;;  %333 = vmatprep.subr.bf16.mxu1 %v929_v10  ;;  %v949_v23 = vld [vmem:[#allocation5 + $0xa0] ss:$16 sps:$4 sm:$0xff]   ;;  %v950_v24 = vld [vmem:[#allocation5 + $0xa8] ss:$16 sps:$4 sm:$0xff]   ;;  %v951_v25 = vld [vmem:[#allocation5 + $0xc4] ss:$16 sps:$4 sm:$0xff]  }
  0x41   :  { %v953_v26 = vld [vmem:[#allocation5 + $0xcc] ss:$16 sps:$4 sm:$0xff]   ;;  %v955_v27 = vld [vmem:[#allocation5 + $0xc0] ss:$16 sps:$4 sm:$0xff]   ;;  %v956_v28 = vld [vmem:[#allocation5 + $0xc8] ss:$16 sps:$4 sm:$0xff]  }
  0x42   :  { %v957_v29 = vld [vmem:[#allocation5 + $0xe4] ss:$16 sps:$4 sm:$0xff]   ;;  %v959_v30 = vld [vmem:[#allocation5 + $0xec] ss:$16 sps:$4 sm:$0xff]   ;;  %v961_v31 = vld [vmem:[#allocation5 + $0xe0] ss:$16 sps:$4 sm:$0xff]  }
  0x43   :  { %291 = vmatpush1.bf16.msra.mxu0 %v931_v11  ;;  %334 = vmatpush1.bf16.msra.mxu1 %v932_v12  ;;  %v962_v32 = vld [vmem:[#allocation5 + $0xe8] ss:$16 sps:$4 sm:$0xff]   ;;  %v69_v33 = vld [vmem:[#allocation2] sm:$0xff]  ;;  %v963_v35 = vld [vmem:[#allocation7 + $0x40] sm:$0xff]   ;;  %v107_v5 = vshrl.u32 %v106_v4, 7  ;;  %s1115_s10 = smov [#allocation8]  }
  0x44   :  { %292 = vmatprep.subr.bf16.mxu0 %v933_v13  ;;  %335 = vmatprep.subr.bf16.mxu1 %v935_v14  ;;  %v964_v36 = vld [vmem:[#allocation7 + $0xc0] sm:$0xff]   ;;  %v71_v39 = vpack.c.bf16 %v70_v34, %v69_v33  ;;  %v967_v40 = vld [vmem:[#allocation7 + $0x48] sm:$0xff]   ;;  %v971_v44 = vld [vmem:[#allocation7 + $0x50] sm:$0xff]   ;;  %s781_s11 = sshll.u32 %s1115_s10, 4  ;;  %s782_s11 = int_to_ptr.vmem [resolvable:$true] %s781_s11 }
  0x45   :  { %v965_v37 = vld [vmem:[#allocation7] sm:$0xff]   ;;  %v968_v41 = vld [vmem:[#allocation7 + $0xc8] sm:$0xff]   ;;  %v972_v45 = vld [vmem:[#allocation7 + $0xd0] sm:$0xff]   ;;  %v108_v6 = vsub.s32 0, %v107_v5  ;;  %v116_v7 = vsub.s32 2, %v107_v5  ;;  %v112_v9 = vsub.s32 1, %v107_v5  ;;  %p1082_p11 = scmp.lt.s32.totalorder %s782_s11, %s782_s11 }
  0x46   :  { %v966_v38 = vld [vmem:[#allocation7 + $0x80] sm:$0xff]   ;;  %v969_v42 = vld [vmem:[#allocation7 + $0x8] sm:$0xff]   ;;  %v973_v46 = vld [vmem:[#allocation7 + $0x10] sm:$0xff]   ;;  %v120_v10 = vsub.s32 3, %v107_v5  ;;  %s1077_s12 = scalar_lea.vmem %s782_s11, 256 }
  0x47   :  { %293 = vmatpush1.bf16.msra.mxu0 %v937_v15  ;;  %336 = vmatpush1.bf16.msra.mxu1 %v938_v16  ;;  %v970_v43 = vld [vmem:[#allocation7 + $0x88] sm:$0xff]   ;;  %v974_v47 = vld [vmem:[#allocation7 + $0x90] sm:$0xff]   ;;  %v975_v48 = vld [vmem:[#allocation7 + $0x58] sm:$0xff]   ;;  %p1078_p10 = scmp.ne.s32.totalorder %s782_s11, %s1077_s12  ;;  %p1083_p12 = scmp.lt.s32.totalorder %s1077_s12, %s1077_s12 }
  0x48   :  { %294 = vmatprep.subr.bf16.mxu0 %v939_v17  ;;  %337 = vmatprep.subr.bf16.mxu1 %v941_v18  ;;  %v976_v49 = vld [vmem:[#allocation7 + $0xd8] sm:$0xff]   ;;  %v979_v52 = vld [vmem:[#allocation7 + $0x60] sm:$0xff]   ;;  %v983_v56 = vld [vmem:[#allocation7 + $0x68] sm:$0xff]  }
  0x49   :  { %v977_v50 = vld [vmem:[#allocation7 + $0x18] sm:$0xff]   ;;  %v980_v53 = vld [vmem:[#allocation7 + $0xe0] sm:$0xff]   ;;  %v984_v57 = vld [vmem:[#allocation7 + $0xe8] sm:$0xff]   ;;  %p1084_p13 = por %p1083_p12, %p1082_p11 }
  0x4a   :  { %v978_v51 = vld [vmem:[#allocation7 + $0x98] sm:$0xff]   ;;  %v981_v54 = vld [vmem:[#allocation7 + $0x20] sm:$0xff]   ;;  %v985_v58 = vld [vmem:[#allocation7 + $0x28] sm:$0xff]  }
  0x4b   :  { %295 = vmatpush1.bf16.msra.mxu0 %v943_v19  ;;  %338 = vmatpush1.bf16.msra.mxu1 %v944_v20  ;;  %v982_v55 = vld [vmem:[#allocation7 + $0xa0] sm:$0xff]   ;;  %v986_v59 = vld [vmem:[#allocation7 + $0xa8] sm:$0xff]   ;;  %v987_v60 = vld [vmem:[#allocation7 + $0x70] sm:$0xff]   ;;  %p1085_p0 = pnand %p1084_p13, %p1078_p10 }
  0x4c   :  { %296 = vmatprep.subr.bf16.mxu0 %v945_v21  ;;  %339 = vmatprep.subr.bf16.mxu1 %v947_v22  ;;  %v988_v61 = vld [vmem:[#allocation7 + $0xf0] sm:$0xff]   ;;  %v991_v0 = vld [vmem:[#allocation7 + $0x78] sm:$0xff]  }
  0x4d   :  { %v989_v62 = vld [vmem:[#allocation7 + $0x30] sm:$0xff]   ;;  %v992_v1 = vld [vmem:[#allocation7 + $0xf8] sm:$0xff]  }
  0x4e   :  { %v990_v63 = vld [vmem:[#allocation7 + $0xb0] sm:$0xff]   ;;  %v993_v2 = vld [vmem:[#allocation7 + $0x38] sm:$0xff]  }
  0x4f   :  { %297 = vmatpush1.bf16.msra.mxu0 %v949_v23  ;;  %340 = vmatpush1.bf16.msra.mxu1 %v950_v24  ;;  %v994_v3 = vld [vmem:[#allocation7 + $0xb8] sm:$0xff]   ;;  %v104_v8 = vld [vmem:[%s1208_s2] sm:$0xf] }
  0x50   :  { %298 = vmatprep.subr.bf16.mxu0 %v951_v25  ;;  %341 = vmatprep.subr.bf16.mxu1 %v953_v26  ;;  %v109_v11 = vrot.slane %v104_v8, %v108_v6  ;;  %v117_v12 = vrot.slane %v104_v8, %v116_v7  ;;  %v113_v13 = vrot.slane %v104_v8, %v112_v9 }
  0x51   :  { %v121_v14 = vrot.slane %v104_v8, %v120_v10 }
  0x53   :  { %299 = vmatpush1.bf16.msra.mxu0 %v955_v27  ;;  %342 = vmatpush1.bf16.msra.mxu1 %v956_v28 }
  0x54   :  { %300 = vmatprep.subr.bf16.mxu0 %v957_v29  ;;  %343 = vmatprep.subr.bf16.mxu1 %v959_v30 }
  0x57   :  { %301 = vmatpush1.bf16.msra.mxu0 %v961_v31  ;;  %344 = vmatpush1.bf16.msra.mxu1 %v962_v32 }
  0x58   :  { %859 = vmatprep.subr.bf16.mxu0 %v963_v35  ;;  %881 = vmatprep.subr.bf16.mxu1 %v964_v36 }
  0x5a   :  { %319 = vmatmul.mubr.bf16.vlgmr.msra.gmra.mrb[0].mxu0 %v71_v39  ;;  %362 = vmatmul.mubr.bf16.vlgmr.msra.gmra.mrb[0].mxu1 %v71_v39 }
  0x5b   :  { %860 = vmatpush3.bf16.msra.mxu0 %v965_v37  ;;  %882 = vmatpush3.bf16.msra.mxu1 %v966_v38 }
  0x5c   :  { %861 = vmatprep.subr.bf16.mxu0 %v967_v40  ;;  %883 = vmatprep.subr.bf16.mxu1 %v968_v41 }
  0x5f   :  { %862 = vmatpush3.bf16.msra.mxu0 %v969_v42  ;;  %884 = vmatpush3.bf16.msra.mxu1 %v970_v43 }
  0x60   :  { %863 = vmatprep.subr.bf16.mxu0 %v971_v44  ;;  %885 = vmatprep.subr.bf16.mxu1 %v972_v45 }
  0x63   :  { %864 = vmatpush3.bf16.msra.mxu0 %v973_v46  ;;  %886 = vmatpush3.bf16.msra.mxu1 %v974_v47 }
  0x64   :  { %865 = vmatprep.subr.bf16.mxu0 %v975_v48  ;;  %887 = vmatprep.subr.bf16.mxu1 %v976_v49 }
  0x67   :  { %866 = vmatpush3.bf16.msra.mxu0 %v977_v50  ;;  %888 = vmatpush3.bf16.msra.mxu1 %v978_v51 }
  0x68   :  { %867 = vmatprep.subr.bf16.mxu0 %v979_v52  ;;  %889 = vmatprep.subr.bf16.mxu1 %v980_v53 }
  0x6b   :  { %868 = vmatpush3.bf16.msra.mxu0 %v981_v54  ;;  %890 = vmatpush3.bf16.msra.mxu1 %v982_v55 }
  0x6c   :  { %869 = vmatprep.subr.bf16.mxu0 %v983_v56  ;;  %891 = vmatprep.subr.bf16.mxu1 %v984_v57 }
  0x6f   :  { %870 = vmatpush3.bf16.msra.mxu0 %v985_v58  ;;  %892 = vmatpush3.bf16.msra.mxu1 %v986_v59 }
  0x70   :  { %871 = vmatprep.subr.bf16.mxu0 %v987_v60  ;;  %893 = vmatprep.subr.bf16.mxu1 %v988_v61 }
  0x73   :  { %872 = vmatpush3.bf16.msra.mxu0 %v989_v62  ;;  %894 = vmatpush3.bf16.msra.mxu1 %v990_v63 }
  0x74   :  { %873 = vmatprep.subr.bf16.mxu0 %v991_v0  ;;  %895 = vmatprep.subr.bf16.mxu1 %v992_v1 }
  0x77   :  { %874 = vmatpush3.bf16.msra.mxu0 %v993_v2  ;;  %896 = vmatpush3.bf16.msra.mxu1 %v994_v3 }
 0x12d   :  { %v320_v15 = vpop.f32.mrb[0].mxu0  ;;  %v363_v16 = vpop.f32.mrb[0].mxu1 }
 0x12e   :  { %v321_v17 = vadd.f32 %v320_v15, %v109_v11  ;;  %v364_v18 = vadd.f32 %v363_v16, %v117_v12  ;;  %v322_v19 = vpop.f32.mrb[1].mxu0  ;;  %v365_v20 = vpop.f32.mrb[1].mxu1 }
 0x12f   :  { %v323_v21 = vadd.f32 %v322_v19, %v113_v13  ;;  %v366_v22 = vadd.f32 %v365_v20, %v121_v14  ;;  %v324_v23 = vpop.f32.mrb[2].mxu0  ;;  %v367_v24 = vpop.f32.mrb[2].mxu1 }
 0x130   :  { %v380_v25 = vmul.f32 0.70710677, %v321_v17  ;;  %v382_v26 = vmul.f32 0.70710677, %v364_v18  ;;  %v325_v29 = vadd.f32 %v324_v23, %v109_v11  ;;  %v368_v30 = vadd.f32 %v367_v24, %v117_v12  ;;  %v326_v31 = vpop.f32.mrb[3].mxu0  ;;  %v369_v32 = vpop.f32.mrb[3].mxu1 }
 0x131   :  { %v381_v27 = vmul.f32 0.70710677, %v323_v21  ;;  %v383_v28 = vmul.f32 0.70710677, %v366_v22  ;;  %v327_v33 = vadd.f32 %v326_v31, %v113_v13  ;;  %v370_v34 = vadd.f32 %v369_v32, %v121_v14  ;;  %v858_v24 = vld [vmem:[%s1210_s4] ss:$0 sm:$0xff] }
 0x132   :  { %995 = verf.f32 %v380_v25  ;;  %v384_v35 = vmul.f32 0.70710677, %v325_v29  ;;  %v386_v36 = vmul.f32 0.70710677, %v368_v30  ;;  %v372_v45 = vmul.f32 0.5, %v321_v17 }
 0x133   :  { %997 = verf.f32 %v382_v26  ;;  %v385_v37 = vmul.f32 0.70710677, %v327_v33  ;;  %v387_v38 = vmul.f32 0.70710677, %v370_v34  ;;  %v374_v46 = vmul.f32 0.5, %v364_v18 }
 0x134   :  { %999 = verf.f32 %v381_v27  ;;  %v373_v49 = vmul.f32 0.5, %v323_v21  ;;  %v376_v51 = vmul.f32 0.5, %v325_v29  ;;  %v375_v54 = vmul.f32 0.5, %v366_v22 }
 0x135   :  { %1001 = verf.f32 %v383_v28  ;;  %v378_v56 = vmul.f32 0.5, %v368_v30  ;;  %v377_v61 = vmul.f32 0.5, %v327_v33  ;;  %v379_v1 = vmul.f32 0.5, %v370_v34 }
 0x136   :  { %1003 = verf.f32 %v384_v35 }
 0x137   :  { %1005 = verf.f32 %v386_v36 }
 0x138   :  { %1007 = verf.f32 %v385_v37 }
 0x139   :  { %1009 = verf.f32 %v387_v38 }
 0x13c   :  { %v996_v39 = vpop.eup %995 }
 0x13d   :  { %v998_v40 = vpop.eup %997  ;;  %v396_v43 = vadd.f32 1.0, %v996_v39 }
 0x13e   :  { %v1000_v41 = vpop.eup %999  ;;  %v398_v47 = vadd.f32 1.0, %v998_v40 }
 0x13f   :  { %v1002_v42 = vpop.eup %1001  ;;  %v397_v50 = vadd.f32 1.0, %v1000_v41  ;;  %v404_v59 = vmul.f32 %v396_v43, %v372_v45 }
 0x140   :  { %v1004_v44 = vpop.eup %1003  ;;  %v399_v55 = vadd.f32 1.0, %v1002_v42  ;;  %v406_v63 = vmul.f32 %v398_v47, %v374_v46 }
 0x141   :  { %v1006_v48 = vpop.eup %1005  ;;  %v400_v52 = vadd.f32 1.0, %v1004_v44  ;;  %v405_v3 = vmul.f32 %v397_v50, %v373_v49 }
 0x142   :  { %v1008_v53 = vpop.eup %1007  ;;  %v402_v57 = vadd.f32 1.0, %v1006_v48  ;;  %v407_v6 = vmul.f32 %v399_v55, %v375_v54 }
 0x143   :  { %v1010_v58 = vpop.eup %1009  ;;  %v408_v60 = vmul.f32 %v400_v52, %v376_v51  ;;  %v401_v62 = vadd.f32 1.0, %v1008_v53 }
 0x144   :  { %v410_v0 = vmul.f32 %v402_v57, %v378_v56  ;;  %v403_v2 = vadd.f32 1.0, %v1010_v58 }
 0x145   :  { %v414_v4 = vpack.c.bf16 %v408_v60, %v404_v59  ;;  %v409_v5 = vmul.f32 %v401_v62, %v377_v61 }
 0x146   :  { %v416_v7 = vpack.c.bf16 %v410_v0, %v406_v63  ;;  %v411_v8 = vmul.f32 %v403_v2, %v379_v1 }
 0x147   :  { %v415_v9 = vpack.c.bf16 %v409_v5, %v405_v3 }
 0x148   :  { %v417_v10 = vpack.c.bf16 %v411_v8, %v407_v6 }
 0x149   :  { %706 = vmatprep.mubr.bf16.mxu0 %v415_v9 }
 0x14a   :  { %747 = vmatprep.mubr.bf16.mxu1 %v417_v10  ;;  %707 = vmatmul.mubr.bf16.vlgmr.msra.gmra.mrb[4].mxu0 %v414_v4 }
 0x14b   :  { %748 = vmatmul.mubr.bf16.vlgmr.msra.gmra.mrb[4].mxu1 %v416_v7 }
 0x21d   :  { %v875_v11 = vpop.f32.mrb[4].mxu0 }
 0x21e   :  { %v897_v12 = vpop.f32.mrb[4].mxu1  ;;  %v876_v13 = vpop.f32.mrb[5].mxu0 }
 0x21f   :  { %v877_v14 = vadd.f32 %v876_v13, %v875_v11  ;;  %v898_v15 = vpop.f32.mrb[5].mxu1  ;;  %v878_v16 = vpop.f32.mrb[6].mxu0 }
 0x220   :  { %v899_v17 = vadd.f32 %v898_v15, %v897_v12  ;;  %v900_v18 = vpop.f32.mrb[6].mxu1  ;;  %v879_v19 = vpop.f32.mrb[7].mxu0 }
 0x221   :  { %v880_v20 = vadd.f32 %v879_v19, %v878_v16  ;;  %v901_v21 = vpop.f32.mrb[7].mxu1 }
 0x222   :  { %v750_v22 = vadd.f32 %v899_v17, %v877_v14  ;;  %v902_v23 = vadd.f32 %v901_v21, %v900_v18 }
 0x224   :  { %v753_v25 = vadd.f32 %v902_v23, %v880_v20  ;;  %v772_v26 = vadd.f32 %v858_v24, %v750_v22 }
 0x226   :  { %v773_v27 = vadd.f32 %v858_v24, %v753_v25  ;;  %774 = vst [vmem:[#allocation8] sm:$0xff] %v772_v26 }
 0x228   :  { %775 = vst [vmem:[#allocation8 + $0x8] sm:$0xff] %v773_v27 }
 0x229   :  { %1088 = shalt.err (!%p1085_p0)
}
 0x22a   :  { %s1089_s15 = scalar_lea.hbm %s1211_s5, 256 }
 0x22b   :  { %p1090_p1 = scmp.ne.s32.totalorder %s1211_s5, %s1089_s15  ;;  %p1093_p2 = scmp.lt.u32.totalorder %s1089_s15, %s1211_s5 }
 0x22d   :  { %p1095_p3 = pnand %p1093_p2, %p1090_p1 }
 0x22f   :  { %1098 = shalt.err (!%p1095_p3)
}
 0x230   :  { %787 = dma.vmem_to_hbm [thread:$0]  %s782_s11, 256, %s1211_s5, [#allocation4], %s1109_s1, %s1109_s1, %s1110_s17  }
 0x231   :  { %1103 = dma.done.wait [#allocation4], 256  }
 0x232   :  { %1104 = vsyncadd [#allocation4], 4294967040 }
 0x233   :  { %791 = vsyncpa [#allocation3], 1 }
 0x234   :  { %792 = vsyncpa [#allocation6], 1 }
 0x235   :  { %793 = vsyncpa [#allocation4], 1 }

</bundles_post_ra>
